<compile_context>
chip_gen: v7x
topology: tpu7x:2x2x1
jax: 0.10.0
libtpu: 0.0.40
codegen_flags: <defaults>
</compile_context>

<pallas_src>
import math

import jax
import jax.numpy as jnp
from jax import lax
from jax.experimental import pallas as pl
from jax.experimental.pallas import tpu as pltpu


_MASK_VALUE = -1e30  # large finite negative: exp() underflows to 0, no inf math


def _tile(dim, preferred, align):
    """Largest tile <= preferred that divides dim and is a multiple of align.
    Falls back to the full dimension (always a legal block shape)."""
    if dim <= preferred:
        return dim
    t = (preferred // align) * align
    while t >= align:
        if dim % t == 0:
            return t
        t -= align
    return dim


def _sublane_align(dtype):
    # f32 -> 8, bf16 -> 16, int8/fp8 -> 32
    return (8 * 4) // jnp.dtype(dtype).itemsize


def _vmem_limit():
    """Scoped VMEM limit: ~75% of physical capacity, capped at 100 MiB.
    On v7x (64 MiB physical) this is 48 MiB; on v5e/v6e (128 MiB) it is 96 MiB."""
    try:
        cap = pltpu.get_tpu_info().vmem_capacity_bytes
    except Exception:
        cap = 64 * 1024 * 1024
    return int(min(cap - cap // 4, 100 * 1024 * 1024))


# --------------------------- tiled projection matmul ---------------------------

def _matmul_kernel(x_ref, w_ref, o_ref, acc_ref):
    @pl.when(pl.program_id(2) == 0)
    def _init():
        acc_ref[...] = jnp.zeros_like(acc_ref)

    acc_ref[...] += jnp.dot(x_ref[...], w_ref[...],
                            preferred_element_type=jnp.float32)

    @pl.when(pl.program_id(2) == pl.num_programs(2) - 1)
    def _finalize():
        o_ref[...] = acc_ref[...].astype(o_ref.dtype)


def linear(x2d, w, *, out_dtype=None, tm=512, tn=1024, tk=512):
    """x2d: [M, K], w: [K, N] -> [M, N], tiled & pipelined over (M, N, K).
    bf16 inputs feed the MXU; accumulation is f32 in VMEM scratch."""
    M, K = x2d.shape
    K2, N = w.shape
    assert K == K2
    if out_dtype is None:
        out_dtype = x2d.dtype
    tm = _tile(M, tm, _sublane_align(x2d.dtype))
    tn = _tile(N, tn, 128)
    tk = _tile(K, tk, 128)
    grid = (M // tm, N // tn, K // tk)
    itemsize = jnp.dtype(x2d.dtype).itemsize
    cost = pl.CostEstimate(
        flops=2 * M * N * K,
        transcendentals=0,
        bytes_accessed=int(itemsize * (M * K + K * N + M * N)),
    )
    return pl.pallas_call(
        _matmul_kernel,
        out_shape=jax.ShapeDtypeStruct((M, N), out_dtype),
        grid_spec=pltpu.PrefetchScalarGridSpec(
            num_scalar_prefetch=0,
            grid=grid,
            in_specs=[
                pl.BlockSpec((tm, tk), lambda i, j, k: (i, k)),
                pl.BlockSpec((tk, tn), lambda i, j, k: (k, j)),
            ],
            out_specs=pl.BlockSpec((tm, tn), lambda i, j, k: (i, j)),
            scratch_shapes=[pltpu.VMEM((tm, tn), jnp.float32)],
        ),
        compiler_params=pltpu.CompilerParams(
            dimension_semantics=("parallel", "parallel", "arbitrary"),
            vmem_limit_bytes=_vmem_limit(),
        ),
        cost_estimate=cost,
    )(x2d, w)


# ----------------- flash attention (causal, GQA, fused RoPE) -------------------

def _flash_attn_kernel(qi_ref, ki_ref, fin_ref,          # scalar-prefetch (SMEM)
                       rope_q_ref, rope_k_ref, q_ref, k_ref, v_ref,
                       o_ref,
                       m_sc, l_sc, acc_sc, qrot_sc):
    # q_ref:      (1, G, tq, D)   all q_per_kv query heads of this kv group
    # k_ref/v_ref:(1, 1, tk, D)
    # rope_*_ref: (2, t, D//2)    [cos; sin]
    _, G, tq, D = q_ref.shape
    tk = k_ref.shape[2]
    M = G * tq
    half = D // 2

    t = pl.program_id(2)
    qi = qi_ref[t]
    ki = ki_ref[t]
    is_final = fin_ref[t] == 1
    min_q = qi * tq
    min_k = ki * tk

    @pl.when(ki == 0)
    def _init():
        m_sc[...] = jnp.full_like(m_sc, _MASK_VALUE)
        l_sc[...] = jnp.zeros_like(l_sc)
        acc_sc[...] = jnp.zeros_like(acc_sc)
        # Rotate-half RoPE on the q tile, once per q tile (the 1/sqrt(D) scale
        # is already folded into wq; wq columns were permuted even|odd in the
        # wrapper so this equals torchtune's interleaved RoPE in the QK score).
        cos = rope_q_ref[0][None]                 # (1, tq, half)
        sin = rope_q_ref[1][None]
        qf = q_ref[0].astype(jnp.float32)         # (G, tq, D)
        q1 = qf[..., :half]
        q2 = qf[..., half:]
        qr = jnp.concatenate([q1 * cos - q2 * sin, q2 * cos + q1 * sin], axis=-1)
        qrot_sc[...] = qr.reshape(M, D).astype(qrot_sc.dtype)

    # Rotate-half RoPE on this k tile.
    cos_k = rope_k_ref[0]                         # (tk, half)
    sin_k = rope_k_ref[1]
    kf = k_ref[0, 0].astype(jnp.float32)          # (tk, D)
    k1 = kf[..., :half]
    k2 = kf[..., half:]
    kr = jnp.concatenate([k1 * cos_k - k2 * sin_k, k2 * cos_k + k1 * sin_k],
                         axis=-1).astype(v_ref.dtype)
    v = v_ref[0, 0]

    def _step(apply_mask):
        q = qrot_sc[...]                          # (M, D) bf16
        # q @ k^T via dot_general contracting last dims (no explicit transpose).
        s = lax.dot_general(q, kr, (((1,), (1,)), ((), ())),
                            preferred_element_type=jnp.float32)   # (M, tk)
        if apply_mask:  # only emitted for tiles straddling the diagonal
            q_pos = min_q + lax.broadcasted_iota(jnp.int32, (tq, tk), 0)
            k_pos = min_k + lax.broadcasted_iota(jnp.int32, (tq, tk), 1)
            mask2d = k_pos <= q_pos                               # (tq, tk)
            mask = jnp.broadcast_to(mask2d[None], (G, tq, tk)).reshape(M, tk)
            s = jnp.where(mask, s, _MASK_VALUE)

        m_prev = m_sc[...]
        m_new = jnp.maximum(m_prev, jnp.max(s, axis=-1, keepdims=True))
        alpha = jnp.exp(m_prev - m_new)
        # TODO(synk): on v6e/v7x, if profiling shows the EUP exp as the binding
        # slot, compute p = jnp.exp((s - m_new).astype(jnp.bfloat16)).
        p = jnp.exp(s - m_new)
        l_sc[...] = alpha * l_sc[...] + jnp.sum(p, axis=-1, keepdims=True)
        acc_sc[...] = alpha * acc_sc[...] + jnp.dot(
            p.astype(v.dtype), v, preferred_element_type=jnp.float32)
        m_sc[...] = m_new

    needs_mask = (min_k + tk - 1) > min_q      # tile straddles the diagonal

    @pl.when(jnp.logical_not(needs_mask))
    def _full_tile():
        _step(apply_mask=False)

    @pl.when(needs_mask)
    def _diag_tile():
        _step(apply_mask=True)

    @pl.when(is_final)
    def _finalize():
        inv_l = pl.reciprocal(l_sc[...], approx=True)   # EUP, off the VPU path
        o_ref[0] = (acc_sc[...] * inv_l).reshape(G, tq, D).astype(o_ref.dtype)


def flash_causal_attention(q, k, v, rope_tab, *, tq=512, tk=512):
    """q: [B, H, S, D]; k, v: [B, Hkv, S, D] (GQA); rope_tab: [2, S, D//2]
    (cos, sin).  Returns [B, H, S, D].  RoPE (rotate-half form) is applied to
    q and k inside the kernel; the caller must have pre-permuted wq/wk columns
    even|odd and folded 1/sqrt(D) into wq."""
    B, H, S, D = q.shape
    Hkv = k.shape[1]
    assert H % Hkv == 0 and D % 2 == 0
    G = H // Hkv
    half = D // 2

    # Cap M = G*tq so the (M, tk) f32 score/prob temporaries stay VMEM-friendly.
    tq = _tile(S, min(tq, max(128, 1024 // G)), max(16, _sublane_align(q.dtype)))
    tk = _tile(S, tk, 128)
    nq = S // tq

    # Only lower-triangle (q-tile, kv-tile) pairs enter the grid.
    qi_list, ki_list, fin_list = [], [], []
    for qi in range(nq):
        last_k = (qi * tq + tq - 1) // tk
        for ki in range(last_k + 1):
            qi_list.append(qi)
            ki_list.append(ki)
            fin_list.append(1 if ki == last_k else 0)
    n_pairs = len(qi_list)
    qi_arr = jnp.asarray(qi_list, jnp.int32)
    ki_arr = jnp.asarray(ki_list, jnp.int32)
    fin_arr = jnp.asarray(fin_list, jnp.int32)

    def q_map(b, g, t, qi_r, ki_r, fin_r):
        return (b, g, qi_r[t], 0)

    def kv_map(b, g, t, qi_r, ki_r, fin_r):
        return (b, g, ki_r[t], 0)

    def rq_map(b, g, t, qi_r, ki_r, fin_r):
        return (0, qi_r[t], 0)

    def rk_map(b, g, t, qi_r, ki_r, fin_r):
        return (0, ki_r[t], 0)

    itemsize = jnp.dtype(q.dtype).itemsize
    cost = pl.CostEstimate(
        flops=int(2 * 2 * B * H * S * S * D * 0.5),          # QK^T + PV, causal ~1/2
        transcendentals=int(B * H * S * S * 0.5),
        bytes_accessed=int(itemsize * (2 * q.size + (nq + 1) * (k.size + v.size) // 2)),
    )

    # Note for v7x megacore: the parallel extent is B*Hkv (the flattened pair
    # axis must stay "arbitrary" because it carries the softmax reduction).
    # TODO(synk): add pipeline_mode=pl.Buffered(3) on the K/V specs if a trace
    # shows exposed DMA on the small KV tiles.
    return pl.pallas_call(
        _flash_attn_kernel,
        out_shape=jax.ShapeDtypeStruct((B, H, S, D), q.dtype),
        grid_spec=pltpu.PrefetchScalarGridSpec(
            num_scalar_prefetch=3,
            grid=(B, Hkv, n_pairs),
            in_specs=[
                pl.BlockSpec((2, tq, half), rq_map),     # cos/sin for q tile
                pl.BlockSpec((2, tk, half), rk_map),     # cos/sin for k tile
                pl.BlockSpec((1, G, tq, D), q_map),
                pl.BlockSpec((1, 1, tk, D), kv_map),
                pl.BlockSpec((1, 1, tk, D), kv_map),
            ],
            out_specs=pl.BlockSpec((1, G, tq, D), q_map),
            scratch_shapes=[
                pltpu.VMEM((G * tq, 1), jnp.float32),    # running max
                pltpu.VMEM((G * tq, 1), jnp.float32),    # running sum
                pltpu.VMEM((G * tq, D), jnp.float32),    # running output acc
                pltpu.VMEM((G * tq, D), q.dtype),        # RoPE'd q tile
            ],
        ),
        compiler_params=pltpu.CompilerParams(
            dimension_semantics=("parallel", "parallel", "arbitrary"),
            vmem_limit_bytes=_vmem_limit(),
        ),
        cost_estimate=cost,
    )(qi_arr, ki_arr, fin_arr, rope_tab, rope_tab, q, k, v)


# ----------------------------------- JAX glue -----------------------------------

def causal_attention_module(x, params, *, num_heads, num_kv_heads, head_dim,
                            rope_base=10000.0, compute_dtype=jnp.bfloat16):
    """Forward pass equivalent to CausalAttention.forward(x, x) with mask=None,
    input_pos=None, kv_cache=None, attn_dropout=0.0."""
    B, S, E = x.shape
    H, Hkv, D = num_heads, num_kv_heads, head_dim
    assert H % Hkv == 0 and D % 2 == 0
    half = D // 2

    # Head-dim permutation (even dims first) so the in-kernel rotate-half RoPE
    # matches torchtune's interleaved RoPE; QK^T is invariant to the shared
    # permutation, so V and wo stay untouched.  Also fold 1/sqrt(D) into wq.
    perm = jnp.concatenate([jnp.arange(0, D, 2), jnp.arange(1, D, 2)])

    def permute_heads(w, n):                      # w: [E, n*D]
        return w.reshape(E, n, D)[:, :, perm].reshape(E, n * D)

    wq = permute_heads(params["wq"], H) * (1.0 / math.sqrt(D))
    wk = permute_heads(params["wk"], Hkv)
    wqkv = jnp.concatenate([wq, wk, params["wv"]], axis=1).astype(compute_dtype)

    # Fused Q/K/V projection: x2d is streamed from HBM once.
    x2d = x.reshape(B * S, E).astype(compute_dtype)
    qkv = linear(x2d, wqkv, out_dtype=compute_dtype)          # [B*S, (H+2*Hkv)*D]

    q = qkv[:, : H * D].reshape(B, S, H, D)
    k = qkv[:, H * D:(H + Hkv) * D].reshape(B, S, Hkv, D)
    v = qkv[:, (H + Hkv) * D:].reshape(B, S, Hkv, D)

    # [B, S, h, D] -> [B, h, S, D]
    # TODO(synk): emit the QKV projection directly in [B, h, S, D] via out_specs
    # index maps (and the attention output in [B, S, H*D]) to drop these passes.
    q = jnp.transpose(q, (0, 2, 1, 3))
    k = jnp.transpose(k, (0, 2, 1, 3))
    v = jnp.transpose(v, (0, 2, 1, 3))

    # RoPE tables (rotate-half form), consumed inside the flash kernel.
    theta = 1.0 / (rope_base ** (jnp.arange(half, dtype=jnp.float32) * 2.0 / D))
    ang = jnp.outer(jnp.arange(S, dtype=jnp.float32), theta)   # (S, half)
    rope_tab = jnp.stack([jnp.cos(ang), jnp.sin(ang)])         # (2, S, half) f32

    o = flash_causal_attention(q, k, v, rope_tab)              # [B, H, S, D]
    o = jnp.transpose(o, (0, 2, 1, 3)).reshape(B * S, H * D)
    out = linear(o, params["wo"].astype(compute_dtype), out_dtype=x.dtype)
    return out.reshape(B, S, E)


# ------------------------- pure-JAX reference (f32) -----------------------------

def _rope_interleaved(x, base=10000.0):
    """Interleaved-pair RoPE (torchtune RotaryPositionalEmbeddings), x: [B,S,H,D]."""
    b, s, h, d = x.shape
    theta = 1.0 / (base ** (jnp.arange(0, d, 2, dtype=jnp.float32) / d))
    pos = jnp.arange(s, dtype=jnp.float32)
    idx = jnp.outer(pos, theta)
    cos = jnp.cos(idx)[None, :, None, :]
    sin = jnp.sin(idx)[None, :, None, :]
    xs = x.reshape(b, s, h, d // 2, 2)
    x0, x1 = xs[..., 0], xs[..., 1]
    o0 = x0 * cos - x1 * sin
    o1 = x1 * cos + x0 * sin
    return jnp.stack([o0, o1], axis=-1).reshape(b, s, h, d)


def _reference(x, params, *, num_heads, num_kv_heads, head_dim):
    B, S, E = x.shape
    x2d = x.reshape(B * S, E)
    q = (x2d @ params["wq"]).reshape(B, S, num_heads, head_dim)
    k = (x2d @ params["wk"]).reshape(B, S, num_kv_heads, head_dim)
    v = (x2d @ params["wv"]).reshape(B, S, num_kv_heads, head_dim)
    q, k = _rope_interleaved(q), _rope_interleaved(k)
    q = jnp.transpose(q, (0, 2, 1, 3))
    k = jnp.transpose(k, (0, 2, 1, 3))
    v = jnp.transpose(v, (0, 2, 1, 3))
    rep = num_heads // num_kv_heads
    k = jnp.repeat(k, rep, axis=1)
    v = jnp.repeat(v, rep, axis=1)
    s = jnp.einsum("bhqd,bhkd->bhqk", q, k) / math.sqrt(head_dim)
    mask = jnp.tril(jnp.ones((S, S), bool))
    s = jnp.where(mask[None, None], s, -jnp.inf)
    p = jax.nn.softmax(s, axis=-1)
    o = jnp.einsum("bhqk,bhkd->bhqd", p, v)
    o = jnp.transpose(o, (0, 2, 1, 3)).reshape(B * S, num_heads * head_dim)
    return (o @ params["wo"]).reshape(B, S, E)


if __name__ == "__main__":
    # Small config consistent with the module's constraints.
    B, S = 2, 8
    embed_dim, num_heads, num_kv_heads, head_dim = 32, 4, 2, 8

    key = jax.random.PRNGKey(0)
    kx, kq, kk, kv, ko = jax.random.split(key, 5)

    x = jax.random.normal(kx, (B, S, embed_dim), dtype=jnp.float32)
    scale = 0.02
    params = {
        # stored as [in_features, out_features] (transposed vs. PyTorch Linear.weight)
        "wq": scale * jax.random.normal(kq, (embed_dim, num_heads * head_dim), jnp.float32),
        "wk": scale * jax.random.normal(kk, (embed_dim, num_kv_heads * head_dim), jnp.float32),
        "wv": scale * jax.random.normal(kv, (embed_dim, num_kv_heads * head_dim), jnp.float32),
        "wo": scale * jax.random.normal(ko, (num_heads * head_dim, embed_dim), jnp.float32),
    }

    out = causal_attention_module(
        x, params, num_heads=num_heads, num_kv_heads=num_kv_heads, head_dim=head_dim
    )
    out = jax.block_until_ready(out)

    ref = _reference(
        x, params, num_heads=num_heads, num_kv_heads=num_kv_heads, head_dim=head_dim
    )
    assert out.shape == (B, S, embed_dim)
    # bf16 MXU path: tolerance reflects bfloat16 input rounding (f32 accumulate).
    assert jnp.allclose(out, ref, atol=2e-2, rtol=2e-2), "mismatch vs reference"

    print("KERNEL_OK")
</pallas_src>

<mosaic_0001>
module attributes {stable_mosaic.version = 11 : i64} {
  func.func @_matmul_kernel(%arg0: i32, %arg1: i32, %arg2: i32, %arg3: memref<16x32xbf16, #tpu.memory_space<vmem>>, %arg4: memref<32x64xbf16, #tpu.memory_space<vmem>>, %arg5: memref<16x64xbf16, #tpu.memory_space<vmem>>, %arg6: memref<16x64xf32, #tpu.memory_space<vmem>>) attributes {dimension_semantics = [#tpu.dimension_semantics<parallel>, #tpu.dimension_semantics<parallel>, #tpu.dimension_semantics<arbitrary>], iteration_bounds = array<i64: 1, 1, 1>, scalar_prefetch = 0 : i64, scratch_operands = 1 : i64, tpu.core_type = #tpu.core_type<tc>, window_params = [{transform_indices = @transform_0, window_bounds = array<i64: 16, 32>}, {transform_indices = @transform_1, window_bounds = array<i64: 32, 64>}, {transform_indices = @transform_2, window_bounds = array<i64: 16, 64>}]} {
    %c0_i32 = arith.constant 0 : i32
    %0 = arith.cmpi eq, %arg2, %c0_i32 : i32
    %1 = arith.extui %0 : i1 to i32
    %c0_i32_0 = arith.constant 0 : i32
    %2 = arith.cmpi ne, %1, %c0_i32_0 : i32
    scf.if %2 {
      %cst_10 = arith.constant 0.000000e+00 : f32
      %12 = vector.broadcast %cst_10 : f32 to vector<16x64xf32>
      %c0_11 = arith.constant 0 : index
      %c0_12 = arith.constant 0 : index
      %13 = vector.load %arg6[%c0_11, %c0_12] : memref<16x64xf32, #tpu.memory_space<vmem>>, vector<16x64xf32>
      tpu.vector_store %arg6[%c0_11, %c0_12], %12 {strides = array<i32>} : memref<16x64xf32, #tpu.memory_space<vmem>>, vector<16x64xf32>,
    } else {
    }
    %c0 = arith.constant 0 : index
    %c0_1 = arith.constant 0 : index
    %3 = vector.load %arg6[%c0, %c0_1] : memref<16x64xf32, #tpu.memory_space<vmem>>, vector<16x64xf32>
    %c0_2 = arith.constant 0 : index
    %c0_3 = arith.constant 0 : index
    %4 = vector.load %arg3[%c0_2, %c0_3] : memref<16x32xbf16, #tpu.memory_space<vmem>>, vector<16x32xbf16>
    %c0_4 = arith.constant 0 : index
    %c0_5 = arith.constant 0 : index
    %5 = vector.load %arg4[%c0_4, %c0_5] : memref<32x64xbf16, #tpu.memory_space<vmem>>, vector<32x64xbf16>
    %cst = arith.constant dense<0.000000e+00> : vector<16x64xf32>
    %6 = tpu.matmul %4, %5, %cst {dimension_numbers = #tpu.dot_dimension_numbers<[1], [0], [0], [1], [0, 0, 1, 1], [], []>} : vector<16x32xbf16>, vector<32x64xbf16>, vector<16x64xf32> -> vector<16x64xf32>
    %7 = arith.addf %3, %6 : vector<16x64xf32>
    %c0_6 = arith.constant 0 : index
    %c0_7 = arith.constant 0 : index
    %8 = vector.load %arg6[%c0_6, %c0_7] : memref<16x64xf32, #tpu.memory_space<vmem>>, vector<16x64xf32>
    tpu.vector_store %arg6[%c0_6, %c0_7], %7 {strides = array<i32>} : memref<16x64xf32, #tpu.memory_space<vmem>>, vector<16x64xf32>,
    %c0_i32_8 = arith.constant 0 : i32
    %9 = arith.cmpi eq, %arg2, %c0_i32_8 : i32
    %10 = arith.extui %9 : i1 to i32
    %c0_i32_9 = arith.constant 0 : i32
    %11 = arith.cmpi ne, %10, %c0_i32_9 : i32
    scf.if %11 {
      %c0_10 = arith.constant 0 : index
      %c0_11 = arith.constant 0 : index
      %12 = vector.load %arg6[%c0_10, %c0_11] : memref<16x64xf32, #tpu.memory_space<vmem>>, vector<16x64xf32>
      %13 = arith.truncf %12 : vector<16x64xf32> to vector<16x64xbf16>
      %c0_12 = arith.constant 0 : index
      %c0_13 = arith.constant 0 : index
      %14 = vector.load %arg5[%c0_12, %c0_13] : memref<16x64xbf16, #tpu.memory_space<vmem>>, vector<16x64xbf16>
      tpu.vector_store %arg5[%c0_12, %c0_13], %13 {strides = array<i32>} : memref<16x64xbf16, #tpu.memory_space<vmem>>, vector<16x64xbf16>,
    } else {
    }
    return
  }
  func.func @transform_0(%arg0: i32, %arg1: i32, %arg2: i32) -> (i32, i32) {
    %c0_i32 = arith.constant 0 : i32
    return %arg0, %arg2 : i32, i32
  }
  func.func @transform_1(%arg0: i32, %arg1: i32, %arg2: i32) -> (i32, i32) {
    %c0_i32 = arith.constant 0 : i32
    return %arg2, %arg1 : i32, i32
  }
  func.func @transform_2(%arg0: i32, %arg1: i32, %arg2: i32) -> (i32, i32) {
    %c0_i32 = arith.constant 0 : i32
    return %arg0, %arg1 : i32, i32
  }
}

</mosaic_0001>

<bundles_post_ra>
// kernel: tpu_custom_call.1
= control target key start
LH: loop header
LB: loop body
LE: loop exit
PB: predicated region body
PF: predicated region fallthrough
CT: control target
= control target key end

     0   :  { %7 = vsyncpa [#allocation4], 0  ;;  %s329_s0 = inlined_call_operand.hbm [shape: bf16[16,32], index: 0, kind: input, shape index: {}]   ;;  %s330_s1 = inlined_call_operand.hbm [shape: bf16[32,64], index: 1, kind: input, shape index: {}]   ;;  %s331_s2 = inlined_call_operand.hbm [shape: bf16[16,64], index: 2, kind: output, shape index: {}]  }
   0x1   :  { %8 = vsyncpa [#allocation7], 0 }
   0x2   :  { %9 = vsyncpa [#allocation5], 0  ;;  %s258_s9 = smov [#allocation3]   ;;  %s186_s13 = scalar_lea.hbm %s329_s0, 128 }
   0x3   :  { %s15_s10 = sshll.u32 %s258_s9, 4  ;;  %p187_p0 = scmp.ne.s32.totalorder %s329_s0, %s186_s13  ;;  %s16_s10 = int_to_ptr.vmem [resolvable:$true] %s15_s10 }
   0x4   :  { %p190_p1 = scmp.lt.u32.totalorder %s186_s13, %s329_s0 }
   0x6   :  { %p192_p2 = pnand %p190_p1, %p187_p0 }
   0x8   :  { %195 = shalt.err (!%p192_p2)
}
   0x9   :  { %s196_s18 = scalar_lea.vmem %s16_s10, 128  ;;  %p201_p4 = scmp.lt.s32.totalorder %s16_s10, %s16_s10 }
   0xa   :  { %p197_p3 = scmp.ne.s32.totalorder %s16_s10, %s196_s18  ;;  %p202_p5 = scmp.lt.s32.totalorder %s196_s18, %s196_s18 }
   0xc   :  { %p203_p6 = por %p202_p5, %p201_p4 }
   0xe   :  { %p204_p7 = pnand %p203_p6, %p197_p3 }
  0x10   :  { %207 = shalt.err (!%p204_p7)
}
  0x11   :  { %s259_s19 = smov 64   ;;  %s260_s20 = smov 4  }
  0x12   :  { %21 = dma.hbm_to_vmem [thread:$0]  %s329_s0, 128, %s16_s10, [#allocation4], %s259_s19, %s259_s19, %s260_s20  }
  0x13   :  { %s261_s23 = smov [#allocation6]   ;;  %s208_s27 = scalar_lea.hbm %s330_s1, 256 }
  0x14   :  { %s27_s24 = sshll.u32 %s261_s23, 4  ;;  %p209_p8 = scmp.ne.s32.totalorder %s330_s1, %s208_s27  ;;  %s28_s24 = int_to_ptr.vmem [resolvable:$true] %s27_s24 }
  0x15   :  { %p212_p9 = scmp.lt.u32.totalorder %s208_s27, %s330_s1 }
  0x17   :  { %p214_p10 = pnand %p212_p9, %p209_p8 }
  0x19   :  { %217 = shalt.err (!%p214_p10)
}
  0x1a   :  { %s218_s4 = scalar_lea.vmem %s28_s24, 256  ;;  %p223_p12 = scmp.lt.s32.totalorder %s28_s24, %s28_s24 }
  0x1b   :  { %p219_p11 = scmp.ne.s32.totalorder %s28_s24, %s218_s4  ;;  %p224_p13 = scmp.lt.s32.totalorder %s218_s4, %s218_s4 }
  0x1d   :  { %p225_p0 = por %p224_p13, %p223_p12 }
  0x1f   :  { %p226_p1 = pnand %p225_p0, %p219_p11 }
  0x21   :  { %229 = shalt.err (!%p226_p1)
}
  0x22   :  { %33 = dma.hbm_to_vmem [thread:$0]  %s330_s1, 256, %s28_s24, [#allocation7], %s259_s19, %s259_s19, %s260_s20  }
  0x23   :  { %252 = dma.done.wait [#allocation4], 128  }
  0x24   :  { %253 = vsyncadd [#allocation4], 4294967168 }
  0x25   :  { %254 = dma.done.wait [#allocation7], 256  }
  0x26   :  { %255 = vsyncadd [#allocation7], 4294967040  ;;  %vm45_vm0 = vcmask 523264   ;;  %v262_v0 = vmov 0.0   ;;  %vm263_vm1 = vmmov 0   ;;  %v183_v1 = vld [vmem:[#allocation6] sm:$0xff]  }
  0x27   :  { %46 = vst.msk [vmem:[#allocation2] sm:$0xff] %vm45_vm0, %v262_v0  ;;  %47 = vst.msk [vmem:[#allocation2 + $0x8] sm:$0xff] %vm45_vm0, %v262_v0  ;;  %168 = vmatprep.subr.bf16.mxu0 %v262_v0  ;;  %172 = vmatprep.mubr.msk.bf16.mxu0 %vm263_vm1, %v262_v0  ;;  %v184_v2 = vld [vmem:[#allocation6 + $0x8] sm:$0xff]   ;;  %v185_v3 = vld [vmem:[#allocation3] sm:$0xff]   ;;  %vm73_vm2 = vcmask 261120   ;;  %vm136_vm3 = vcmask 519168  }
  0x28   :  { %169 = vmatpush3.bf16.msra.mxu0 %v183_v1  ;;  %s264_s1 = smov [#allocation8]  }
  0x29   :  { %170 = vmatprep.subr.bf16.mxu0 %v262_v0  ;;  %s144_s6 = sshll.u32 %s264_s1, 4  ;;  %s145_s6 = int_to_ptr.vmem [resolvable:$true] %s144_s6 }
  0x2a   :  { %s230_s7 = scalar_lea.vmem %s145_s6, 128  ;;  %p235_p3 = scmp.lt.s32.totalorder %s145_s6, %s145_s6 }
  0x2b   :  { %p231_p2 = scmp.ne.s32.totalorder %s145_s6, %s230_s7  ;;  %p236_p4 = scmp.lt.s32.totalorder %s230_s7, %s230_s7 }
  0x2c   :  { %171 = vmatpush3.bf16.msra.mxu0 %v184_v2 }
  0x2d   :  { %p237_p5 = por %p236_p4, %p235_p3 }
  0x2e   :  { %v48_v4 = vld [vmem:[#allocation2] sm:$0xff]  ;;  %v49_v6 = vld [vmem:[#allocation2 + $0x8] sm:$0xff] }
  0x2f   :  { %173 = vmatmul.mubr.msk.bf16.vlgmr.msra.gmra.mrb[0].mxu0 %vm73_vm2, %v185_v3  ;;  %p238_p6 = pnand %p237_p5, %p231_p2 }
 0x102   :  { %v111_v5 = vpop.f32.mrb[0].mxu0 }
 0x103   :  { %v118_v7 = vadd.f32 %v111_v5, %v48_v4  ;;  %v174_v8 = vpop.f32.mrb[1].mxu0 }
 0x104   :  { %v114_v9 = vpop.f32.mrb[2].mxu0 }
 0x105   :  { %121 = vst.msk [vmem:[#allocation2] sm:$0xff] %vm45_vm0, %v118_v7  ;;  %v119_v10 = vadd.f32 %v114_v9, %v49_v6  ;;  %v175_v11 = vpop.f32.mrb[3].mxu0 }
 0x107   :  { %122 = vst.msk [vmem:[#allocation2 + $0x8] sm:$0xff] %vm45_vm0, %v119_v10 }
 0x10c   :  { %v126_v12 = vld [vmem:[#allocation2] sm:$0xff] }
 0x10d   :  { %v163_v13 = vpack.c.bf16 %v126_v12, %v126_v12 }
 0x10e   :  { %v127_v14 = vld [vmem:[#allocation2 + $0x8] sm:$0xff] }
 0x10f   :  { %v164_v15 = vpack.c.bf16 %v127_v14, %v127_v14  ;;  %137 = vst.msk [vmem:[#allocation8] sm:$0xf] %vm136_vm3, %v163_v13 }
 0x111   :  { %138 = vst.msk [vmem:[#allocation8 + $0x4] sm:$0xf] %vm136_vm3, %v164_v15 }
 0x112   :  { %241 = shalt.err (!%p238_p6)
}
 0x113   :  { %s242_s10 = scalar_lea.hbm %s331_s2, 128 }
 0x114   :  { %p243_p7 = scmp.ne.s32.totalorder %s331_s2, %s242_s10  ;;  %p246_p8 = scmp.lt.u32.totalorder %s242_s10, %s331_s2 }
 0x116   :  { %p248_p9 = pnand %p246_p8, %p243_p7 }
 0x118   :  { %251 = shalt.err (!%p248_p9)
}
 0x119   :  { %150 = dma.vmem_to_hbm [thread:$0]  %s145_s6, 128, %s331_s2, [#allocation5], %s259_s19, %s259_s19, %s260_s20  }
 0x11a   :  { %256 = dma.done.wait [#allocation5], 128  }
 0x11b   :  { %257 = vsyncadd [#allocation5], 4294967168 }
 0x11c   :  { %154 = vsyncpa [#allocation4], 1 }
 0x11d   :  { %155 = vsyncpa [#allocation7], 1 }
 0x11e   :  { %156 = vsyncpa [#allocation5], 1 }

</bundles_post_ra>
